<compile_context>
chip_gen: v7x
topology: tpu7x:2x2x1
jax: 0.10.0
libtpu: 0.0.40
codegen_flags: <defaults>
</compile_context>

<pallas_src>
import jax
import jax.numpy as jnp
from jax.experimental import pallas as pl
from jax.experimental.pallas import tpu as pltpu


_MIN_CHUNK_BYTES = 8 * 1024 * 1024   # don't bother splitting copies below ~16 MiB
_MAX_CHUNKS = 4                       # max DMAs kept in flight simultaneously


def _chunk_bounds(leading, total_bytes):
    """Static chunk boundaries along the leading dim (Python ints only)."""
    if leading < 2 or total_bytes < 2 * _MIN_CHUNK_BYTES:
        return (0, leading)
    n = int(min(_MAX_CHUNKS, leading, total_bytes // _MIN_CHUNK_BYTES))
    base, rem = divmod(leading, n)
    bounds = [0]
    for c in range(n):
        bounds.append(bounds[-1] + base + (1 if c < rem else 0))
    return tuple(bounds)


def _make_identity_kernel(bounds):
    """HBM->HBM copy: issue all chunk DMAs, then wait on all of them."""
    n_chunks = len(bounds) - 1

    def kernel(x_ref, o_ref, sems):
        copies = []
        for c in range(n_chunks):          # static Python loop, static slices
            lo, hi = bounds[c], bounds[c + 1]
            cp = pltpu.make_async_copy(
                x_ref.at[lo:hi], o_ref.at[lo:hi], sems.at[c]
            )
            cp.start()
            copies.append(cp)
        for cp in copies:
            cp.wait()

    return kernel


def qidentity(x):
    """Pallas identity: returns an array equal to x (same shape/dtype)."""
    # Degenerate cases: a kernel has nothing to do.
    if x.ndim == 0 or x.size == 0:
        return x

    total_bytes = int(x.size) * int(jnp.dtype(x.dtype).itemsize)
    bounds = _chunk_bounds(int(x.shape[0]), total_bytes)
    n_chunks = len(bounds) - 1

    return pl.pallas_call(
        _make_identity_kernel(bounds),
        out_shape=jax.ShapeDtypeStruct(x.shape, x.dtype),
        in_specs=[pl.BlockSpec(memory_space=pl.ANY)],    # raw HBM ref, no auto-DMA
        out_specs=pl.BlockSpec(memory_space=pl.ANY),
        scratch_shapes=[pltpu.SemaphoreType.DMA((n_chunks,))],
        compiler_params=pltpu.CompilerParams(has_side_effects=True),
        cost_estimate=pl.CostEstimate(
            flops=0, transcendentals=0, bytes_accessed=2 * total_bytes
        ),
    )(x)


if __name__ == "__main__":
    key = jax.random.PRNGKey(0)

    # NCHW input, small shape consistent with a conv-style activation
    x = jax.random.normal(key, (2, 4, 16, 16), dtype=jnp.float32)
    y = jax.block_until_ready(qidentity(x))
    assert y.shape == x.shape, (y.shape, x.shape)
    assert y.dtype == x.dtype, (y.dtype, x.dtype)
    assert bool(jnp.all(y == x)), "identity mismatch"

    # odd, non-(8,128)-aligned shape: no padding / relayout needed anymore
    x_odd = jax.random.normal(jax.random.PRNGKey(1), (3, 5, 7), dtype=jnp.float32)
    y_odd = jax.block_until_ready(qidentity(x_odd))
    assert y_odd.shape == x_odd.shape
    assert bool(jnp.all(y_odd == x_odd)), "identity mismatch (odd shape)"

    # sub-32-bit dtype path
    x_bf = jax.random.normal(jax.random.PRNGKey(2), (8, 32), dtype=jnp.bfloat16)
    y_bf = jax.block_until_ready(qidentity(x_bf))
    assert y_bf.dtype == x_bf.dtype
    assert bool(jnp.all(y_bf == x_bf)), "identity mismatch (bf16)"

    print("KERNEL_OK")
</pallas_src>

<mosaic_0001>
module attributes {stable_mosaic.version = 11 : i64} {
  func.func @kernel(%arg0: memref<2x4x16x16xf32, #tpu.memory_space<any>>, %arg1: memref<2x4x16x16xf32, #tpu.memory_space<any>>, %arg2: memref<1x!tpu.dma_semaphore, #tpu.memory_space<semaphore_mem>>) attributes {dimension_semantics = [], scalar_prefetch = 0 : i64, scratch_operands = 1 : i64, tpu.core_type = #tpu.core_type<tc>} {
    %c0_i32 = arith.constant 0 : i32
    %c0_i32_0 = arith.constant 0 : i32
    %c0_i32_1 = arith.constant 0 : i32
    %c0_i32_2 = arith.constant 0 : i32
    %c0_i32_3 = arith.constant 0 : i32
    %0 = tpu.memref_slice %arg0[%c0_i32_0, %c0_i32_1, %c0_i32_2, %c0_i32_3] : memref<2x4x16x16xf32, #tpu.memory_space<any>> -> memref<2x4x16x16xf32, #tpu.memory_space<any>>
    %c0_i32_4 = arith.constant 0 : i32
    %c0_i32_5 = arith.constant 0 : i32
    %c0_i32_6 = arith.constant 0 : i32
    %c0_i32_7 = arith.constant 0 : i32
    %1 = tpu.memref_slice %arg1[%c0_i32_4, %c0_i32_5, %c0_i32_6, %c0_i32_7] : memref<2x4x16x16xf32, #tpu.memory_space<any>> -> memref<2x4x16x16xf32, #tpu.memory_space<any>>
    %2 = tpu.memref_slice %arg2[%c0_i32] : memref<1x!tpu.dma_semaphore, #tpu.memory_space<semaphore_mem>> -> memref<1x!tpu.dma_semaphore, #tpu.memory_space<semaphore_mem>>
    %3 = tpu.memref_squeeze %2 : memref<1x!tpu.dma_semaphore, #tpu.memory_space<semaphore_mem>> -> memref<!tpu.dma_semaphore, #tpu.memory_space<semaphore_mem>>
    tpu.enqueue_dma source(%0 : memref<2x4x16x16xf32, #tpu.memory_space<any>>) target(%1 : memref<2x4x16x16xf32, #tpu.memory_space<any>>) target_semaphore(%3 : memref<!tpu.dma_semaphore, #tpu.memory_space<semaphore_mem>>)
    %c0_i32_8 = arith.constant 0 : i32
    %c0_i32_9 = arith.constant 0 : i32
    %c0_i32_10 = arith.constant 0 : i32
    %c0_i32_11 = arith.constant 0 : i32
    %c0_i32_12 = arith.constant 0 : i32
    %4 = tpu.memref_slice %arg0[%c0_i32_9, %c0_i32_10, %c0_i32_11, %c0_i32_12] : memref<2x4x16x16xf32, #tpu.memory_space<any>> -> memref<2x4x16x16xf32, #tpu.memory_space<any>>
    %c0_i32_13 = arith.constant 0 : i32
    %c0_i32_14 = arith.constant 0 : i32
    %c0_i32_15 = arith.constant 0 : i32
    %c0_i32_16 = arith.constant 0 : i32
    %5 = tpu.memref_slice %arg1[%c0_i32_13, %c0_i32_14, %c0_i32_15, %c0_i32_16] : memref<2x4x16x16xf32, #tpu.memory_space<any>> -> memref<2x4x16x16xf32, #tpu.memory_space<any>>
    %6 = tpu.memref_slice %arg2[%c0_i32_8] : memref<1x!tpu.dma_semaphore, #tpu.memory_space<semaphore_mem>> -> memref<1x!tpu.dma_semaphore, #tpu.memory_space<semaphore_mem>>
    %7 = tpu.memref_squeeze %6 : memref<1x!tpu.dma_semaphore, #tpu.memory_space<semaphore_mem>> -> memref<!tpu.dma_semaphore, #tpu.memory_space<semaphore_mem>>
    tpu.wait_dma2 semaphore(%7 : memref<!tpu.dma_semaphore, #tpu.memory_space<semaphore_mem>>) src(%4 : memref<2x4x16x16xf32, #tpu.memory_space<any>>) dst(%5 : memref<2x4x16x16xf32, #tpu.memory_space<any>>)
    return
  }
}

</mosaic_0001>

<bundles_post_ra>
// kernel: tpu_custom_call.1
= control target key start
LH: loop header
LB: loop body
LE: loop exit
PB: predicated region body
PF: predicated region fallthrough
CT: control target
= control target key end

     0   :  { %s36_s6 = smov [#allocation2]   ;;  %s37_s7 = smov [#allocation3]   ;;  %s55_s0 = inlined_call_operand.hbm [shape: f32[2,4,16,16], index: 0, kind: input, shape index: {}]   ;;  %s56_s1 = inlined_call_operand.hbm [shape: f32[2,4,16,16], index: 1, kind: output, shape index: {}]  }
   0x1   :  { %s38_s8 = smov 0  }
   0x2   :  { %18 = dma.general %s55_s0, 2048, %s56_s1, %s36_s6, %s37_s7, [#allocation4], %s38_s8, 0  }
   0x3   :  { %34 = dma.done.wait [#allocation2], 2048 }
   0x4   :  { %35 = vsyncadd [#allocation2], 4294965248 }
   0x5   :  { %24 = vsyncmov [#allocation2] }
   0x8   :  { %s25_s13 = vpop.sfrf %24 }
   0x9   :  { %p30_p0 = scmp.ne.s32.totalorder %s25_s13, 0 }
   0xb   :  { %29 = shalt.err (%p30_p0)  }

</bundles_post_ra>
